<compile_context>
chip_gen: v7x
topology: tpu7x:2x2x1
jax: 0.10.0
libtpu: 0.0.40
codegen_flags: <defaults>
</compile_context>

<pallas_src>
import jax
import jax.numpy as jnp
from jax.experimental import pallas as pl
from jax.experimental.pallas import tpu as pltpu

# Vocabulary exactly as in the PyTorch script.
sentences = ['Kage is Teacher', 'Mazong is Boss', 'Niuzong is Boss',
             'Xiaobing is Student', 'Xiaoxue is Student']
words = ' '.join(sentences).split()
word_list = sorted(set(words))     # sorted -> deterministic ordering
VOC_SIZE = len(word_list)          # 9
EMBEDDING_SIZE = 2


def _round_up(x, m):
    return (x + m - 1) // m * m


def _pick_tn(voc_size):
    # Lane-dense vocab tile width.
    #  - toy vocab (this script): one 128-wide tile already covers the padded
    #    vocab; the kernel sits at the per-step overhead floor anyway.
    #  - real vocab: 512-wide tiles sit near the HBM roofline, always leave
    #    >= 2 'parallel'-shardable vocab tiles (v7x second TensorCore), and
    #    keep the double-buffered (TB, TN) + (EMB, TN) tiles well inside v7x's
    #    64 MiB VMEM / 32 MiB scoped default.
    return 128 if voc_size <= 256 else 512


TN = _pick_tn(VOC_SIZE)                      # lane-dense vocab tile width
VOC_PAD = _round_up(VOC_SIZE, TN)            # padded vocab (lane-dense output)
W1_ROWS = _round_up(VOC_SIZE, 8)             # sublane-aligned embedding table


def skipgram_kernel(idx_ref, w1t_hbm, w2t_ref, out_ref, hidden_ref, row_sem):
    """One (batch tile, vocab tile) grid step.

    idx_ref   : SMEM [b_pad] int32   scalar-prefetched center-word ids
    w1t_hbm   : HBM  [W1_ROWS, EMB]  W1.T embedding table (stays in HBM)
    w2t_ref   : VMEM [EMB, TN]       W2.T slab for this vocab tile
    out_ref   : VMEM [TB, TN]        lane-dense logits tile
    hidden_ref: VMEM [TB, EMB]       gathered embeddings (persists across j)
    row_sem   : DMA sems [TB]
    """
    i = pl.program_id(0)                     # batch tile (parallel)
    j = pl.program_id(1)                     # vocab tile (arbitrary, inner)
    tb, emb = hidden_ref.shape

    # 1) hidden = one_hot(idx) @ W1.T  ==  row gather from W1.T in HBM.
    #    Done once per batch tile; the scratch persists across the sequential
    #    vocab axis, so the gather is NOT recomputed per vocab tile.
    @pl.when(j == 0)
    def _gather():
        b0 = i * tb
        copies = []
        for r in range(tb):                  # TB async row DMAs, overlapped
            cp = pltpu.make_async_copy(
                w1t_hbm.at[pl.ds(idx_ref[b0 + r], 1), :],
                hidden_ref.at[pl.ds(r, 1), :],
                row_sem.at[r])
            cp.start()
            copies.append(cp)
        for cp in copies:
            cp.wait()

    # 2) out = hidden @ W2.T for this vocab slab.
    h = hidden_ref[...]                              # (TB, EMB) f32
    w2t = w2t_ref[...].astype(jnp.float32)           # f32 math (v5e-safe)
    if emb >= 16:
        # Real embedding sizes: push the K-deep contraction through the MXU.
        out_ref[...] = jnp.dot(
            h, w2t, preferred_element_type=jnp.float32).astype(out_ref.dtype)
    else:
        # K == 2 here: two VPU broadcast FMAs beat a ~1%-utilized MXU pass.
        acc = h[:, 0:1] * w2t[0:1, :]
        for e in range(1, emb):
            acc = acc + h[:, e:e + 1] * w2t[e:e + 1, :]
        out_ref[...] = acc.astype(out_ref.dtype)


def prepare_weights(w1, w2, weight_dtype=jnp.float32):
    """One-time layout prep (outside the per-step hot path).

    w1: [emb, voc] (PyTorch input_to_hidden.weight)
    w2: [voc, emb] (PyTorch hidden_to_output.weight)
    weight_dtype: storage dtype for W2.T.  At real vocab sizes the kernel is
      memory-bound on streaming W2.T + logits, so bf16 here ~halves HBM bytes;
      in-kernel math stays f32.  Default f32 keeps the toy check tight.
    """
    w1t = jnp.zeros((W1_ROWS, EMBEDDING_SIZE), jnp.float32)
    w1t = w1t.at[:VOC_SIZE, :].set(w1.T)                 # [W1_ROWS, emb]
    w2t = jnp.zeros((EMBEDDING_SIZE, VOC_PAD), jnp.float32)
    w2t = w2t.at[:, :VOC_SIZE].set(w2.T)                 # [emb, VOC_PAD]
    return w1t, w2t.astype(weight_dtype)


def skipgram_forward(idx, w1t_pad, w2t_pad):
    """idx: [batch] int center-word indices (argmax of the one-hot X)."""
    batch = idx.shape[0]
    # Batch tile: 8 rows (one f32 sublane tile) for tiny batches; 64 rows for
    # larger batches so the per-row DMA gather unroll stays bounded while the
    # (TB, TN) output tile is still large.
    tb = 8 if batch <= 8 else 64
    b_pad = _round_up(max(batch, tb), tb)
    # Clip defensively (OOB ids would otherwise only hit the DMA bounds check);
    # padded rows gather row 0, which is sliced off below.
    idx_pad = jnp.zeros((b_pad,), jnp.int32).at[:batch].set(
        jnp.clip(idx.astype(jnp.int32), 0, VOC_SIZE - 1))

    n_b = b_pad // tb
    n_v = VOC_PAD // TN

    grid_spec = pltpu.PrefetchScalarGridSpec(
        num_scalar_prefetch=1,                           # idx -> SMEM
        grid=(n_b, n_v),
        in_specs=[
            pl.BlockSpec(memory_space=pl.ANY),           # W1.T stays in HBM
            pl.BlockSpec((EMBEDDING_SIZE, TN), lambda i, j, ids: (0, j)),
        ],
        out_specs=pl.BlockSpec((tb, TN), lambda i, j, ids: (i, j)),
        scratch_shapes=[
            pltpu.VMEM((tb, EMBEDDING_SIZE), jnp.float32),   # gathered hidden
            pltpu.SemaphoreType.DMA((tb,)),                  # per-row gather sems
        ],
    )

    out = pl.pallas_call(
        skipgram_kernel,
        out_shape=jax.ShapeDtypeStruct((b_pad, VOC_PAD), jnp.float32),
        grid_spec=grid_spec,
        compiler_params=pltpu.CompilerParams(
            # Batch tiles are independent -> megacore-shardable on v7x; the
            # vocab axis carries the hidden-scratch reuse, so it is arbitrary.
            dimension_semantics=("parallel", "arbitrary")),
    )(idx_pad, w1t_pad, w2t_pad)

    # Slice padded output back to the exact PyTorch shape.  If the consumer
    # accepts the padded (b_pad, VOC_PAD) layout (e.g. a masked softmax loss),
    # skip this slice to avoid an extra full-logits HBM round trip.
    return out[:batch, :VOC_SIZE]


if __name__ == "__main__":
    key = jax.random.PRNGKey(0)
    k1, k2, k3 = jax.random.split(key, 3)

    # Deterministic synthetic parameters (shapes match nn.Linear weights).
    w1 = jax.random.uniform(k1, (EMBEDDING_SIZE, VOC_SIZE), jnp.float32,
                            minval=-0.5, maxval=0.5)     # input_to_hidden.weight
    w2 = jax.random.uniform(k2, (VOC_SIZE, EMBEDDING_SIZE), jnp.float32,
                            minval=-0.5, maxval=0.5)     # hidden_to_output.weight

    # SkipGram inputs are one-hot center-word vectors: pass the indices.
    batch = 5
    idx = jax.random.randint(k3, (batch,), 0, VOC_SIZE)

    w1t_pad, w2t_pad = prepare_weights(w1, w2)           # one-time layout prep
    out = skipgram_forward(idx, w1t_pad, w2t_pad)
    out = jax.block_until_ready(out)

    # Pure-JAX reference (same semantics as the PyTorch forward on one-hot X).
    x = jax.nn.one_hot(idx, VOC_SIZE, dtype=jnp.float32)
    ref = (x @ w1.T) @ w2.T
    assert out.shape == (batch, VOC_SIZE)
    assert jnp.allclose(out, ref, atol=1e-5, rtol=1e-5)

    print("KERNEL_OK")
</pallas_src>

<mosaic_0001>
module attributes {stable_mosaic.version = 11 : i64} {
  func.func @skipgram_kernel(%arg0: i32, %arg1: i32, %arg2: memref<8xi32, #tpu.memory_space<smem>>, %arg3: memref<16x2xf32, #tpu.memory_space<any>>, %arg4: memref<2x128xf32, #tpu.memory_space<vmem>>, %arg5: memref<8x128xf32, #tpu.memory_space<vmem>>, %arg6: memref<8x2xf32, #tpu.memory_space<vmem>>, %arg7: memref<8x!tpu.dma_semaphore, #tpu.memory_space<semaphore_mem>>) attributes {dimension_semantics = [#tpu.dimension_semantics<parallel>, #tpu.dimension_semantics<arbitrary>], iteration_bounds = array<i64: 1, 1>, scalar_prefetch = 1 : i64, scratch_operands = 2 : i64, tpu.core_type = #tpu.core_type<tc>, window_params = [{}, {transform_indices = @transform_1, window_bounds = array<i64: 2, 128>}, {transform_indices = @transform_2, window_bounds = array<i64: 8, 128>}]} {
    %c0_i32 = arith.constant 0 : i32
    %0 = arith.cmpi eq, %arg1, %c0_i32 : i32
    %1 = arith.extui %0 : i1 to i32
    %c0_i32_0 = arith.constant 0 : i32
    %2 = arith.cmpi ne, %1, %c0_i32_0 : i32
    scf.if %2 {
      %c8_i32 = arith.constant 8 : i32
      %17 = arith.muli %arg0, %c8_i32 : i32
      %c0_i32_6 = arith.constant 0 : i32
      %18 = arith.addi %17, %c0_i32_6 : i32
      %19 = arith.index_cast %18 : i32 to index
      %20 = memref.load %arg2[%19] : memref<8xi32, #tpu.memory_space<smem>>
      %c0_i32_7 = arith.constant 0 : i32
      %c0_i32_8 = arith.constant 0 : i32
      %21 = tpu.memref_slice %arg3[%20, %c0_i32_8] : memref<16x2xf32, #tpu.memory_space<any>> -> memref<1x2xf32, #tpu.memory_space<any>>
      %c0_i32_9 = arith.constant 0 : i32
      %c0_i32_10 = arith.constant 0 : i32
      %22 = tpu.memref_slice %arg6[%c0_i32_9, %c0_i32_10] : memref<8x2xf32, #tpu.memory_space<vmem>> -> memref<1x2xf32, #tpu.memory_space<vmem>>
      %23 = tpu.memref_slice %arg7[%c0_i32_7] : memref<8x!tpu.dma_semaphore, #tpu.memory_space<semaphore_mem>> -> memref<1x!tpu.dma_semaphore, #tpu.memory_space<semaphore_mem>>
      %24 = tpu.memref_squeeze %23 : memref<1x!tpu.dma_semaphore, #tpu.memory_space<semaphore_mem>> -> memref<!tpu.dma_semaphore, #tpu.memory_space<semaphore_mem>>
      tpu.enqueue_dma source(%21 : memref<1x2xf32, #tpu.memory_space<any>>) target(%22 : memref<1x2xf32, #tpu.memory_space<vmem>>) target_semaphore(%24 : memref<!tpu.dma_semaphore, #tpu.memory_space<semaphore_mem>>)
      %c1_i32 = arith.constant 1 : i32
      %25 = arith.addi %17, %c1_i32 : i32
      %26 = arith.index_cast %25 : i32 to index
      %27 = memref.load %arg2[%26] : memref<8xi32, #tpu.memory_space<smem>>
      %c1_i32_11 = arith.constant 1 : i32
      %c0_i32_12 = arith.constant 0 : i32
      %28 = tpu.memref_slice %arg3[%27, %c0_i32_12] : memref<16x2xf32, #tpu.memory_space<any>> -> memref<1x2xf32, #tpu.memory_space<any>>
      %c1_i32_13 = arith.constant 1 : i32
      %c0_i32_14 = arith.constant 0 : i32
      %29 = tpu.memref_slice %arg6[%c1_i32_13, %c0_i32_14] : memref<8x2xf32, #tpu.memory_space<vmem>> -> memref<1x2xf32, #tpu.memory_space<vmem>>
      %30 = tpu.memref_slice %arg7[%c1_i32_11] : memref<8x!tpu.dma_semaphore, #tpu.memory_space<semaphore_mem>> -> memref<1x!tpu.dma_semaphore, #tpu.memory_space<semaphore_mem>>
      %31 = tpu.memref_squeeze %30 : memref<1x!tpu.dma_semaphore, #tpu.memory_space<semaphore_mem>> -> memref<!tpu.dma_semaphore, #tpu.memory_space<semaphore_mem>>
      tpu.enqueue_dma source(%28 : memref<1x2xf32, #tpu.memory_space<any>>) target(%29 : memref<1x2xf32, #tpu.memory_space<vmem>>) target_semaphore(%31 : memref<!tpu.dma_semaphore, #tpu.memory_space<semaphore_mem>>)
      %c2_i32 = arith.constant 2 : i32
      %32 = arith.addi %17, %c2_i32 : i32
      %33 = arith.index_cast %32 : i32 to index
      %34 = memref.load %arg2[%33] : memref<8xi32, #tpu.memory_space<smem>>
      %c2_i32_15 = arith.constant 2 : i32
      %c0_i32_16 = arith.constant 0 : i32
      %35 = tpu.memref_slice %arg3[%34, %c0_i32_16] : memref<16x2xf32, #tpu.memory_space<any>> -> memref<1x2xf32, #tpu.memory_space<any>>
      %c2_i32_17 = arith.constant 2 : i32
      %c0_i32_18 = arith.constant 0 : i32
      %36 = tpu.memref_slice %arg6[%c2_i32_17, %c0_i32_18] : memref<8x2xf32, #tpu.memory_space<vmem>> -> memref<1x2xf32, #tpu.memory_space<vmem>>
      %37 = tpu.memref_slice %arg7[%c2_i32_15] : memref<8x!tpu.dma_semaphore, #tpu.memory_space<semaphore_mem>> -> memref<1x!tpu.dma_semaphore, #tpu.memory_space<semaphore_mem>>
      %38 = tpu.memref_squeeze %37 : memref<1x!tpu.dma_semaphore, #tpu.memory_space<semaphore_mem>> -> memref<!tpu.dma_semaphore, #tpu.memory_space<semaphore_mem>>
      tpu.enqueue_dma source(%35 : memref<1x2xf32, #tpu.memory_space<any>>) target(%36 : memref<1x2xf32, #tpu.memory_space<vmem>>) target_semaphore(%38 : memref<!tpu.dma_semaphore, #tpu.memory_space<semaphore_mem>>)
      %c3_i32 = arith.constant 3 : i32
      %39 = arith.addi %17, %c3_i32 : i32
      %40 = arith.index_cast %39 : i32 to index
      %41 = memref.load %arg2[%40] : memref<8xi32, #tpu.memory_space<smem>>
      %c3_i32_19 = arith.constant 3 : i32
      %c0_i32_20 = arith.constant 0 : i32
      %42 = tpu.memref_slice %arg3[%41, %c0_i32_20] : memref<16x2xf32, #tpu.memory_space<any>> -> memref<1x2xf32, #tpu.memory_space<any>>
      %c3_i32_21 = arith.constant 3 : i32
      %c0_i32_22 = arith.constant 0 : i32
      %43 = tpu.memref_slice %arg6[%c3_i32_21, %c0_i32_22] : memref<8x2xf32, #tpu.memory_space<vmem>> -> memref<1x2xf32, #tpu.memory_space<vmem>>
      %44 = tpu.memref_slice %arg7[%c3_i32_19] : memref<8x!tpu.dma_semaphore, #tpu.memory_space<semaphore_mem>> -> memref<1x!tpu.dma_semaphore, #tpu.memory_space<semaphore_mem>>
      %45 = tpu.memref_squeeze %44 : memref<1x!tpu.dma_semaphore, #tpu.memory_space<semaphore_mem>> -> memref<!tpu.dma_semaphore, #tpu.memory_space<semaphore_mem>>
      tpu.enqueue_dma source(%42 : memref<1x2xf32, #tpu.memory_space<any>>) target(%43 : memref<1x2xf32, #tpu.memory_space<vmem>>) target_semaphore(%45 : memref<!tpu.dma_semaphore, #tpu.memory_space<semaphore_mem>>)
      %c4_i32 = arith.constant 4 : i32
      %46 = arith.addi %17, %c4_i32 : i32
      %47 = arith.index_cast %46 : i32 to index
      %48 = memref.load %arg2[%47] : memref<8xi32, #tpu.memory_space<smem>>
      %c4_i32_23 = arith.constant 4 : i32
      %c0_i32_24 = arith.constant 0 : i32
      %49 = tpu.memref_slice %arg3[%48, %c0_i32_24] : memref<16x2xf32, #tpu.memory_space<any>> -> memref<1x2xf32, #tpu.memory_space<any>>
      %c4_i32_25 = arith.constant 4 : i32
      %c0_i32_26 = arith.constant 0 : i32
      %50 = tpu.memref_slice %arg6[%c4_i32_25, %c0_i32_26] : memref<8x2xf32, #tpu.memory_space<vmem>> -> memref<1x2xf32, #tpu.memory_space<vmem>>
      %51 = tpu.memref_slice %arg7[%c4_i32_23] : memref<8x!tpu.dma_semaphore, #tpu.memory_space<semaphore_mem>> -> memref<1x!tpu.dma_semaphore, #tpu.memory_space<semaphore_mem>>
      %52 = tpu.memref_squeeze %51 : memref<1x!tpu.dma_semaphore, #tpu.memory_space<semaphore_mem>> -> memref<!tpu.dma_semaphore, #tpu.memory_space<semaphore_mem>>
      tpu.enqueue_dma source(%49 : memref<1x2xf32, #tpu.memory_space<any>>) target(%50 : memref<1x2xf32, #tpu.memory_space<vmem>>) target_semaphore(%52 : memref<!tpu.dma_semaphore, #tpu.memory_space<semaphore_mem>>)
      %c5_i32 = arith.constant 5 : i32
      %53 = arith.addi %17, %c5_i32 : i32
      %54 = arith.index_cast %53 : i32 to index
      %55 = memref.load %arg2[%54] : memref<8xi32, #tpu.memory_space<smem>>
      %c5_i32_27 = arith.constant 5 : i32
      %c0_i32_28 = arith.constant 0 : i32
      %56 = tpu.memref_slice %arg3[%55, %c0_i32_28] : memref<16x2xf32, #tpu.memory_space<any>> -> memref<1x2xf32, #tpu.memory_space<any>>
      %c5_i32_29 = arith.constant 5 : i32
      %c0_i32_30 = arith.constant 0 : i32
      %57 = tpu.memref_slice %arg6[%c5_i32_29, %c0_i32_30] : memref<8x2xf32, #tpu.memory_space<vmem>> -> memref<1x2xf32, #tpu.memory_space<vmem>>
      %58 = tpu.memref_slice %arg7[%c5_i32_27] : memref<8x!tpu.dma_semaphore, #tpu.memory_space<semaphore_mem>> -> memref<1x!tpu.dma_semaphore, #tpu.memory_space<semaphore_mem>>
      %59 = tpu.memref_squeeze %58 : memref<1x!tpu.dma_semaphore, #tpu.memory_space<semaphore_mem>> -> memref<!tpu.dma_semaphore, #tpu.memory_space<semaphore_mem>>
      tpu.enqueue_dma source(%56 : memref<1x2xf32, #tpu.memory_space<any>>) target(%57 : memref<1x2xf32, #tpu.memory_space<vmem>>) target_semaphore(%59 : memref<!tpu.dma_semaphore, #tpu.memory_space<semaphore_mem>>)
      %c6_i32 = arith.constant 6 : i32
      %60 = arith.addi %17, %c6_i32 : i32
      %61 = arith.index_cast %60 : i32 to index
      %62 = memref.load %arg2[%61] : memref<8xi32, #tpu.memory_space<smem>>
      %c6_i32_31 = arith.constant 6 : i32
      %c0_i32_32 = arith.constant 0 : i32
      %63 = tpu.memref_slice %arg3[%62, %c0_i32_32] : memref<16x2xf32, #tpu.memory_space<any>> -> memref<1x2xf32, #tpu.memory_space<any>>
      %c6_i32_33 = arith.constant 6 : i32
      %c0_i32_34 = arith.constant 0 : i32
      %64 = tpu.memref_slice %arg6[%c6_i32_33, %c0_i32_34] : memref<8x2xf32, #tpu.memory_space<vmem>> -> memref<1x2xf32, #tpu.memory_space<vmem>>
      %65 = tpu.memref_slice %arg7[%c6_i32_31] : memref<8x!tpu.dma_semaphore, #tpu.memory_space<semaphore_mem>> -> memref<1x!tpu.dma_semaphore, #tpu.memory_space<semaphore_mem>>
      %66 = tpu.memref_squeeze %65 : memref<1x!tpu.dma_semaphore, #tpu.memory_space<semaphore_mem>> -> memref<!tpu.dma_semaphore, #tpu.memory_space<semaphore_mem>>
      tpu.enqueue_dma source(%63 : memref<1x2xf32, #tpu.memory_space<any>>) target(%64 : memref<1x2xf32, #tpu.memory_space<vmem>>) target_semaphore(%66 : memref<!tpu.dma_semaphore, #tpu.memory_space<semaphore_mem>>)
      %c7_i32 = arith.constant 7 : i32
      %67 = arith.addi %17, %c7_i32 : i32
      %68 = arith.index_cast %67 : i32 to index
      %69 = memref.load %arg2[%68] : memref<8xi32, #tpu.memory_space<smem>>
      %c7_i32_35 = arith.constant 7 : i32
      %c0_i32_36 = arith.constant 0 : i32
      %70 = tpu.memref_slice %arg3[%69, %c0_i32_36] : memref<16x2xf32, #tpu.memory_space<any>> -> memref<1x2xf32, #tpu.memory_space<any>>
      %c7_i32_37 = arith.constant 7 : i32
      %c0_i32_38 = arith.constant 0 : i32
      %71 = tpu.memref_slice %arg6[%c7_i32_37, %c0_i32_38] : memref<8x2xf32, #tpu.memory_space<vmem>> -> memref<1x2xf32, #tpu.memory_space<vmem>>
      %72 = tpu.memref_slice %arg7[%c7_i32_35] : memref<8x!tpu.dma_semaphore, #tpu.memory_space<semaphore_mem>> -> memref<1x!tpu.dma_semaphore, #tpu.memory_space<semaphore_mem>>
      %73 = tpu.memref_squeeze %72 : memref<1x!tpu.dma_semaphore, #tpu.memory_space<semaphore_mem>> -> memref<!tpu.dma_semaphore, #tpu.memory_space<semaphore_mem>>
      tpu.enqueue_dma source(%70 : memref<1x2xf32, #tpu.memory_space<any>>) target(%71 : memref<1x2xf32, #tpu.memory_space<vmem>>) target_semaphore(%73 : memref<!tpu.dma_semaphore, #tpu.memory_space<semaphore_mem>>)
      %c0_i32_39 = arith.constant 0 : i32
      %c0_i32_40 = arith.constant 0 : i32
      %74 = tpu.memref_slice %arg3[%20, %c0_i32_40] : memref<16x2xf32, #tpu.memory_space<any>> -> memref<1x2xf32, #tpu.memory_space<any>>
      %c0_i32_41 = arith.constant 0 : i32
      %c0_i32_42 = arith.constant 0 : i32
      %75 = tpu.memref_slice %arg6[%c0_i32_41, %c0_i32_42] : memref<8x2xf32, #tpu.memory_space<vmem>> -> memref<1x2xf32, #tpu.memory_space<vmem>>
      %76 = tpu.memref_slice %arg7[%c0_i32_39] : memref<8x!tpu.dma_semaphore, #tpu.memory_space<semaphore_mem>> -> memref<1x!tpu.dma_semaphore, #tpu.memory_space<semaphore_mem>>
      %77 = tpu.memref_squeeze %76 : memref<1x!tpu.dma_semaphore, #tpu.memory_space<semaphore_mem>> -> memref<!tpu.dma_semaphore, #tpu.memory_space<semaphore_mem>>
      tpu.wait_dma2 semaphore(%77 : memref<!tpu.dma_semaphore, #tpu.memory_space<semaphore_mem>>) src(%74 : memref<1x2xf32, #tpu.memory_space<any>>) dst(%75 : memref<1x2xf32, #tpu.memory_space<vmem>>)
      %c1_i32_43 = arith.constant 1 : i32
      %c0_i32_44 = arith.constant 0 : i32
      %78 = tpu.memref_slice %arg3[%27, %c0_i32_44] : memref<16x2xf32, #tpu.memory_space<any>> -> memref<1x2xf32, #tpu.memory_space<any>>
      %c1_i32_45 = arith.constant 1 : i32
      %c0_i32_46 = arith.constant 0 : i32
      %79 = tpu.memref_slice %arg6[%c1_i32_45, %c0_i32_46] : memref<8x2xf32, #tpu.memory_space<vmem>> -> memref<1x2xf32, #tpu.memory_space<vmem>>
      %80 = tpu.memref_slice %arg7[%c1_i32_43] : memref<8x!tpu.dma_semaphore, #tpu.memory_space<semaphore_mem>> -> memref<1x!tpu.dma_semaphore, #tpu.memory_space<semaphore_mem>>
      %81 = tpu.memref_squeeze %80 : memref<1x!tpu.dma_semaphore, #tpu.memory_space<semaphore_mem>> -> memref<!tpu.dma_semaphore, #tpu.memory_space<semaphore_mem>>
      tpu.wait_dma2 semaphore(%81 : memref<!tpu.dma_semaphore, #tpu.memory_space<semaphore_mem>>) src(%78 : memref<1x2xf32, #tpu.memory_space<any>>) dst(%79 : memref<1x2xf32, #tpu.memory_space<vmem>>)
      %c2_i32_47 = arith.constant 2 : i32
      %c0_i32_48 = arith.constant 0 : i32
      %82 = tpu.memref_slice %arg3[%34, %c0_i32_48] : memref<16x2xf32, #tpu.memory_space<any>> -> memref<1x2xf32, #tpu.memory_space<any>>
      %c2_i32_49 = arith.constant 2 : i32
      %c0_i32_50 = arith.constant 0 : i32
      %83 = tpu.memref_slice %arg6[%c2_i32_49, %c0_i32_50] : memref<8x2xf32, #tpu.memory_space<vmem>> -> memref<1x2xf32, #tpu.memory_space<vmem>>
      %84 = tpu.memref_slice %arg7[%c2_i32_47] : memref<8x!tpu.dma_semaphore, #tpu.memory_space<semaphore_mem>> -> memref<1x!tpu.dma_semaphore, #tpu.memory_space<semaphore_mem>>
      %85 = tpu.memref_squeeze %84 : memref<1x!tpu.dma_semaphore, #tpu.memory_space<semaphore_mem>> -> memref<!tpu.dma_semaphore, #tpu.memory_space<semaphore_mem>>
      tpu.wait_dma2 semaphore(%85 : memref<!tpu.dma_semaphore, #tpu.memory_space<semaphore_mem>>) src(%82 : memref<1x2xf32, #tpu.memory_space<any>>) dst(%83 : memref<1x2xf32, #tpu.memory_space<vmem>>)
      %c3_i32_51 = arith.constant 3 : i32
      %c0_i32_52 = arith.constant 0 : i32
      %86 = tpu.memref_slice %arg3[%41, %c0_i32_52] : memref<16x2xf32, #tpu.memory_space<any>> -> memref<1x2xf32, #tpu.memory_space<any>>
      %c3_i32_53 = arith.constant 3 : i32
      %c0_i32_54 = arith.constant 0 : i32
      %87 = tpu.memref_slice %arg6[%c3_i32_53, %c0_i32_54] : memref<8x2xf32, #tpu.memory_space<vmem>> -> memref<1x2xf32, #tpu.memory_space<vmem>>
      %88 = tpu.memref_slice %arg7[%c3_i32_51] : memref<8x!tpu.dma_semaphore, #tpu.memory_space<semaphore_mem>> -> memref<1x!tpu.dma_semaphore, #tpu.memory_space<semaphore_mem>>
      %89 = tpu.memref_squeeze %88 : memref<1x!tpu.dma_semaphore, #tpu.memory_space<semaphore_mem>> -> memref<!tpu.dma_semaphore, #tpu.memory_space<semaphore_mem>>
      tpu.wait_dma2 semaphore(%89 : memref<!tpu.dma_semaphore, #tpu.memory_space<semaphore_mem>>) src(%86 : memref<1x2xf32, #tpu.memory_space<any>>) dst(%87 : memref<1x2xf32, #tpu.memory_space<vmem>>)
      %c4_i32_55 = arith.constant 4 : i32
      %c0_i32_56 = arith.constant 0 : i32
      %90 = tpu.memref_slice %arg3[%48, %c0_i32_56] : memref<16x2xf32, #tpu.memory_space<any>> -> memref<1x2xf32, #tpu.memory_space<any>>
      %c4_i32_57 = arith.constant 4 : i32
      %c0_i32_58 = arith.constant 0 : i32
      %91 = tpu.memref_slice %arg6[%c4_i32_57, %c0_i32_58] : memref<8x2xf32, #tpu.memory_space<vmem>> -> memref<1x2xf32, #tpu.memory_space<vmem>>
      %92 = tpu.memref_slice %arg7[%c4_i32_55] : memref<8x!tpu.dma_semaphore, #tpu.memory_space<semaphore_mem>> -> memref<1x!tpu.dma_semaphore, #tpu.memory_space<semaphore_mem>>
      %93 = tpu.memref_squeeze %92 : memref<1x!tpu.dma_semaphore, #tpu.memory_space<semaphore_mem>> -> memref<!tpu.dma_semaphore, #tpu.memory_space<semaphore_mem>>
      tpu.wait_dma2 semaphore(%93 : memref<!tpu.dma_semaphore, #tpu.memory_space<semaphore_mem>>) src(%90 : memref<1x2xf32, #tpu.memory_space<any>>) dst(%91 : memref<1x2xf32, #tpu.memory_space<vmem>>)
      %c5_i32_59 = arith.constant 5 : i32
      %c0_i32_60 = arith.constant 0 : i32
      %94 = tpu.memref_slice %arg3[%55, %c0_i32_60] : memref<16x2xf32, #tpu.memory_space<any>> -> memref<1x2xf32, #tpu.memory_space<any>>
      %c5_i32_61 = arith.constant 5 : i32
      %c0_i32_62 = arith.constant 0 : i32
      %95 = tpu.memref_slice %arg6[%c5_i32_61, %c0_i32_62] : memref<8x2xf32, #tpu.memory_space<vmem>> -> memref<1x2xf32, #tpu.memory_space<vmem>>
      %96 = tpu.memref_slice %arg7[%c5_i32_59] : memref<8x!tpu.dma_semaphore, #tpu.memory_space<semaphore_mem>> -> memref<1x!tpu.dma_semaphore, #tpu.memory_space<semaphore_mem>>
      %97 = tpu.memref_squeeze %96 : memref<1x!tpu.dma_semaphore, #tpu.memory_space<semaphore_mem>> -> memref<!tpu.dma_semaphore, #tpu.memory_space<semaphore_mem>>
      tpu.wait_dma2 semaphore(%97 : memref<!tpu.dma_semaphore, #tpu.memory_space<semaphore_mem>>) src(%94 : memref<1x2xf32, #tpu.memory_space<any>>) dst(%95 : memref<1x2xf32, #tpu.memory_space<vmem>>)
      %c6_i32_63 = arith.constant 6 : i32
      %c0_i32_64 = arith.constant 0 : i32
      %98 = tpu.memref_slice %arg3[%62, %c0_i32_64] : memref<16x2xf32, #tpu.memory_space<any>> -> memref<1x2xf32, #tpu.memory_space<any>>
      %c6_i32_65 = arith.constant 6 : i32
      %c0_i32_66 = arith.constant 0 : i32
      %99 = tpu.memref_slice %arg6[%c6_i32_65, %c0_i32_66] : memref<8x2xf32, #tpu.memory_space<vmem>> -> memref<1x2xf32, #tpu.memory_space<vmem>>
      %100 = tpu.memref_slice %arg7[%c6_i32_63] : memref<8x!tpu.dma_semaphore, #tpu.memory_space<semaphore_mem>> -> memref<1x!tpu.dma_semaphore, #tpu.memory_space<semaphore_mem>>
      %101 = tpu.memref_squeeze %100 : memref<1x!tpu.dma_semaphore, #tpu.memory_space<semaphore_mem>> -> memref<!tpu.dma_semaphore, #tpu.memory_space<semaphore_mem>>
      tpu.wait_dma2 semaphore(%101 : memref<!tpu.dma_semaphore, #tpu.memory_space<semaphore_mem>>) src(%98 : memref<1x2xf32, #tpu.memory_space<any>>) dst(%99 : memref<1x2xf32, #tpu.memory_space<vmem>>)
      %c7_i32_67 = arith.constant 7 : i32
      %c0_i32_68 = arith.constant 0 : i32
      %102 = tpu.memref_slice %arg3[%69, %c0_i32_68] : memref<16x2xf32, #tpu.memory_space<any>> -> memref<1x2xf32, #tpu.memory_space<any>>
      %c7_i32_69 = arith.constant 7 : i32
      %c0_i32_70 = arith.constant 0 : i32
      %103 = tpu.memref_slice %arg6[%c7_i32_69, %c0_i32_70] : memref<8x2xf32, #tpu.memory_space<vmem>> -> memref<1x2xf32, #tpu.memory_space<vmem>>
      %104 = tpu.memref_slice %arg7[%c7_i32_67] : memref<8x!tpu.dma_semaphore, #tpu.memory_space<semaphore_mem>> -> memref<1x!tpu.dma_semaphore, #tpu.memory_space<semaphore_mem>>
      %105 = tpu.memref_squeeze %104 : memref<1x!tpu.dma_semaphore, #tpu.memory_space<semaphore_mem>> -> memref<!tpu.dma_semaphore, #tpu.memory_space<semaphore_mem>>
      tpu.wait_dma2 semaphore(%105 : memref<!tpu.dma_semaphore, #tpu.memory_space<semaphore_mem>>) src(%102 : memref<1x2xf32, #tpu.memory_space<any>>) dst(%103 : memref<1x2xf32, #tpu.memory_space<vmem>>)
    } else {
    }
    %c0 = arith.constant 0 : index
    %c0_1 = arith.constant 0 : index
    %3 = vector.load %arg6[%c0, %c0_1] : memref<8x2xf32, #tpu.memory_space<vmem>>, vector<8x2xf32>
    %c0_2 = arith.constant 0 : index
    %c0_3 = arith.constant 0 : index
    %4 = vector.load %arg4[%c0_2, %c0_3] : memref<2x128xf32, #tpu.memory_space<vmem>>, vector<2x128xf32>
    %5 = vector.extract_strided_slice %3 {offsets = [0, 0], sizes = [8, 1], strides = [1, 1]} : vector<8x2xf32> to vector<8x1xf32>
    %6 = vector.extract_strided_slice %4 {offsets = [0, 0], sizes = [1, 128], strides = [1, 1]} : vector<2x128xf32> to vector<1x128xf32>
    %7 = vector.broadcast %5 : vector<8x1xf32> to vector<8x128xf32>
    %8 = vector.broadcast %6 : vector<1x128xf32> to vector<8x128xf32>
    %9 = arith.mulf %7, %8 : vector<8x128xf32>
    %10 = vector.extract_strided_slice %3 {offsets = [0, 1], sizes = [8, 1], strides = [1, 1]} : vector<8x2xf32> to vector<8x1xf32>
    %11 = vector.extract_strided_slice %4 {offsets = [1, 0], sizes = [1, 128], strides = [1, 1]} : vector<2x128xf32> to vector<1x128xf32>
    %12 = vector.broadcast %10 : vector<8x1xf32> to vector<8x128xf32>
    %13 = vector.broadcast %11 : vector<1x128xf32> to vector<8x128xf32>
    %14 = arith.mulf %12, %13 : vector<8x128xf32>
    %15 = arith.addf %9, %14 : vector<8x128xf32>
    %c0_4 = arith.constant 0 : index
    %c0_5 = arith.constant 0 : index
    %16 = vector.load %arg5[%c0_4, %c0_5] : memref<8x128xf32, #tpu.memory_space<vmem>>, vector<8x128xf32>
    tpu.vector_store %arg5[%c0_4, %c0_5], %15 {strides = array<i32>} : memref<8x128xf32, #tpu.memory_space<vmem>>, vector<8x128xf32>,
    return
  }
  func.func @transform_1(%arg0: i32, %arg1: i32, %arg2: memref<8xi32, #tpu.memory_space<smem>>) -> (i32, i32) {
    %c0_i32 = arith.constant 0 : i32
    %c0_i32_0 = arith.constant 0 : i32
    return %c0_i32, %arg1 : i32, i32
  }
  func.func @transform_2(%arg0: i32, %arg1: i32, %arg2: memref<8xi32, #tpu.memory_space<smem>>) -> (i32, i32) {
    %c0_i32 = arith.constant 0 : i32
    return %arg0, %arg1 : i32, i32
  }
}

</mosaic_0001>

<bundles_post_ra>
// kernel: tpu_custom_call.1
= control target key start
LH: loop header
LB: loop body
LE: loop exit
PB: predicated region body
PF: predicated region fallthrough
CT: control target
= control target key end

     0   :  { %s756_s0 = inlined_call_operand.vmem [shape: s32[8], index: 0, kind: input, shape index: {}]   ;;  %s757_s1 = inlined_call_operand.vmem [shape: f32[16,2], index: 1, kind: input, shape index: {}]   ;;  %s758_s2 = inlined_call_operand.vmem [shape: f32[2,128], index: 2, kind: input, shape index: {}]   ;;  %s759_s3 = inlined_call_operand.hbm [shape: f32[8,128], index: 3, kind: output, shape index: {}]  }
   0x1   :  { %s8_s14 = sshll.u32 %s756_s0, 4  ;;  %s9_s14 = int_to_ptr.vmem [resolvable:$true] %s8_s14 }
   0x2   :  { %s636_s15 = scalar_lea.vmem %s9_s14, 16  ;;  %p641_p1 = scmp.lt.s32.totalorder %s9_s14, %s9_s14 }
   0x3   :  { %p637_p0 = scmp.ne.s32.totalorder %s9_s14, %s636_s15  ;;  %p642_p2 = scmp.lt.s32.totalorder %s636_s15, %s636_s15 }
   0x5   :  { %p643_p3 = por %p642_p2, %p641_p1 }
   0x7   :  { %p644_p4 = pnand %p643_p3, %p637_p0 }
   0x9   :  { %647 = shalt.err (!%p644_p4)  }
   0xa   :  { %s690_s16 = smov [#allocation5]  }
   0xb   :  { %11 = dma.vmem_to_smem %s9_s14, 16, %s690_s16, [#allocation4] }
   0xc   :  { %670 = dma.done.wait [#allocation4], 16 }
   0xd   :  { %671 = vsyncadd [#allocation4], 4294967280 }
   0xe   :  { %13 = sfence }
   0xf   :  { %14 = vsyncpa [#allocation7], 0  ;;  %s22_s17 = sld [smem:[#allocation5]] }
  0x15   :  { %s23_s20 = scalar_lea.vmem %s757_s1, %s22_s17 }
  0x16   :  { %v41_v0 = vld [vmem:[%s23_s20] sm:$0x1] }
  0x17   :  { %42 = vst [vmem:[#allocation2] sm:$0x1] %v41_v0 }
  0x18   :  { %67 = vsyncadd [#allocation3], 16  ;;  %s615_s0 = sld [smem:[#allocation5 + $0x1]] }
  0x1e   :  { %s70_s23 = scalar_lea.vmem %s757_s1, %s615_s0 }
  0x1f   :  { %v90_v1 = vld [vmem:[%s70_s23] sm:$0x1] }
  0x20   :  { %91 = vst [vmem:[#allocation2 + $0x1] sm:$0x1] %v90_v1 }
  0x21   :  { %116 = vsyncadd [#allocation3 + $0x1], 16  ;;  %s616_s24 = sld [smem:[#allocation5 + $0x2]] }
  0x27   :  { %s119_s27 = scalar_lea.vmem %s757_s1, %s616_s24 }
  0x28   :  { %v139_v2 = vld [vmem:[%s119_s27] sm:$0x1] }
  0x29   :  { %140 = vst [vmem:[#allocation2 + $0x2] sm:$0x1] %v139_v2 }
  0x2a   :  { %165 = vsyncadd [#allocation3 + $0x2], 16  ;;  %s617_s28 = sld [smem:[#allocation5 + $0x3]] }
  0x30   :  { %s168_s4 = scalar_lea.vmem %s757_s1, %s617_s28 }
  0x31   :  { %v188_v3 = vld [vmem:[%s168_s4] sm:$0x1] }
  0x32   :  { %189 = vst [vmem:[#allocation2 + $0x3] sm:$0x1] %v188_v3 }
  0x33   :  { %214 = vsyncadd [#allocation3 + $0x3], 16  ;;  %s618_s5 = sld [smem:[#allocation5 + $0x4]] }
  0x39   :  { %s217_s8 = scalar_lea.vmem %s757_s1, %s618_s5 }
  0x3a   :  { %v237_v4 = vld [vmem:[%s217_s8] sm:$0x1] }
  0x3b   :  { %238 = vst [vmem:[#allocation2 + $0x4] sm:$0x1] %v237_v4 }
  0x3c   :  { %263 = vsyncadd [#allocation3 + $0x4], 16  ;;  %s619_s9 = sld [smem:[#allocation5 + $0x5]] }
  0x42   :  { %s266_s12 = scalar_lea.vmem %s757_s1, %s619_s9 }
  0x43   :  { %v286_v5 = vld [vmem:[%s266_s12] sm:$0x1] }
  0x44   :  { %287 = vst [vmem:[#allocation2 + $0x5] sm:$0x1] %v286_v5 }
  0x45   :  { %312 = vsyncadd [#allocation3 + $0x5], 16  ;;  %s620_s13 = sld [smem:[#allocation5 + $0x6]] }
  0x4b   :  { %s315_s16 = scalar_lea.vmem %s757_s1, %s620_s13 }
  0x4c   :  { %v335_v6 = vld [vmem:[%s315_s16] sm:$0x1] }
  0x4d   :  { %336 = vst [vmem:[#allocation2 + $0x6] sm:$0x1] %v335_v6 }
  0x4e   :  { %361 = vsyncadd [#allocation3 + $0x6], 16  ;;  %s621_s17 = sld [smem:[#allocation5 + $0x7]] }
  0x54   :  { %s364_s20 = scalar_lea.vmem %s757_s1, %s621_s17 }
  0x55   :  { %v384_v7 = vld [vmem:[%s364_s20] sm:$0x1] }
  0x56   :  { %385 = vst [vmem:[#allocation2 + $0x7] sm:$0x1] %v384_v7 }
  0x57   :  { %410 = vsyncadd [#allocation3 + $0x7], 16 }
  0x58   :  { %672 = dma.done.wait [#allocation3], 16 }
  0x59   :  { %673 = vsyncadd [#allocation3], 4294967280 }
  0x5a   :  { %674 = dma.done.wait [#allocation3 + $0x1], 16 }
  0x5b   :  { %675 = vsyncadd [#allocation3 + $0x1], 4294967280 }
  0x5c   :  { %676 = dma.done.wait [#allocation3 + $0x2], 16 }
  0x5d   :  { %677 = vsyncadd [#allocation3 + $0x2], 4294967280 }
  0x5e   :  { %678 = dma.done.wait [#allocation3 + $0x3], 16 }
  0x5f   :  { %679 = vsyncadd [#allocation3 + $0x3], 4294967280 }
  0x60   :  { %680 = dma.done.wait [#allocation3 + $0x4], 16 }
  0x61   :  { %681 = vsyncadd [#allocation3 + $0x4], 4294967280 }
  0x62   :  { %682 = dma.done.wait [#allocation3 + $0x5], 16 }
  0x63   :  { %683 = vsyncadd [#allocation3 + $0x5], 4294967280 }
  0x64   :  { %684 = dma.done.wait [#allocation3 + $0x6], 16 }
  0x65   :  { %685 = vsyncadd [#allocation3 + $0x6], 4294967280 }
  0x66   :  { %686 = dma.done.wait [#allocation3 + $0x7], 16 }
  0x67   :  { %687 = vsyncadd [#allocation3 + $0x7], 4294967280  ;;  %v691_v8 = vmov 0   ;;  %v428_v9 = vld [vmem:[#allocation2] sm:$0xff]  ;;  %v692_v10 = vmov 1   ;;  %v435_v11 = vlaneseq  ;;  %s693_s21 = smov [#allocation6]  }
  0x68   :  { %634 = vset.pattern.permute.xlu0 %v691_v8  ;;  %v429_v15 = vld [vmem:[%s758_s2] sm:$0x3]  ;;  %s457_s22 = sshll.u32 %s693_s21, 4  ;;  %s458_s22 = int_to_ptr.vmem [resolvable:$true] %s457_s22 }
  0x69   :  { %432 = vperm.xlu0 %634, %v428_v9   ;;  %v436_v12 = vshrl.u32 %v435_v11, 7  ;;  %s648_s23 = scalar_lea.vmem %s458_s22, 128  ;;  %p653_p6 = scmp.lt.s32.totalorder %s458_s22, %s458_s22 }
  0x6a   :  { %p649_p5 = scmp.ne.s32.totalorder %s458_s22, %s648_s23  ;;  %p654_p7 = scmp.lt.s32.totalorder %s648_s23, %s648_s23 }
  0x6b   :  { %v437_v13 = vsub.s32 0, %v436_v12  ;;  %v446_v14 = vsub.s32 1, %v436_v12 }
  0x6c   :  { %p655_p8 = por %p654_p7, %p653_p6 }
  0x6d   :  { %635 = vset.pattern.permute.xlu0 %v692_v10  ;;  %v438_v17 = vrot.slane %v429_v15, %v437_v13  ;;  %v447_v18 = vrot.slane %v429_v15, %v446_v14 }
  0x6e   :  { %441 = vperm.xlu0 %635, %v428_v9   ;;  %p656_p9 = pnand %p655_p8, %p649_p5 }
  0xe8   :  { %v433_v16 = vpop.permute.xlu0 %432 }
  0xe9   :  { %v439_v20 = vmul.f32 %v438_v17, %v433_v16 }
  0xed   :  { %v442_v19 = vpop.permute.xlu0 %441 }
  0xee   :  { %v448_v21 = vmul.f32 %v447_v18, %v442_v19 }
  0xf0   :  { %v449_v22 = vadd.f32 %v448_v21, %v439_v20 }
  0xf2   :  { %450 = vst [vmem:[#allocation6] sm:$0xff] %v449_v22 }
  0xf3   :  { %659 = shalt.err (!%p656_p9)
}
  0xf4   :  { %s660_s25 = scalar_lea.hbm %s759_s3, 128 }
  0xf5   :  { %p661_p10 = scmp.ne.s32.totalorder %s759_s3, %s660_s25  ;;  %p664_p11 = scmp.lt.u32.totalorder %s660_s25, %s759_s3 }
  0xf7   :  { %p666_p12 = pnand %p664_p11, %p661_p10 }
  0xf9   :  { %669 = shalt.err (!%p666_p12)
}
  0xfa   :  { %460 = dma.vmem_to_hbm [thread:$0]  %s458_s22, 128, %s759_s3, [#allocation7]  }
  0xfb   :  { %688 = dma.done.wait [#allocation7], 128  }
  0xfc   :  { %689 = vsyncadd [#allocation7], 4294967168 }
  0xfd   :  { %464 = vsyncpa [#allocation7], 1 }
  0xfe   :  { %465 = vsyncmov [#allocation3] }
 0x101   :  { %s466_s5 = vpop.sfrf %465 }
 0x102   :  { %p622_p13 = scmp.ne.s32.totalorder %s466_s5, 0 }
 0x104   :  { %470 = shalt.err (%p622_p13)  }
 0x105   :  { %472 = vsyncmov [#allocation3 + $0x1] }
 0x108   :  { %s473_s6 = vpop.sfrf %472 }
 0x109   :  { %p623_p0 = scmp.ne.s32.totalorder %s473_s6, 0 }
 0x10b   :  { %477 = shalt.err (%p623_p0)  }
 0x10c   :  { %479 = vsyncmov [#allocation3 + $0x2] }
 0x10f   :  { %s480_s7 = vpop.sfrf %479 }
 0x110   :  { %p624_p1 = scmp.ne.s32.totalorder %s480_s7, 0 }
 0x112   :  { %484 = shalt.err (%p624_p1)  }
 0x113   :  { %486 = vsyncmov [#allocation3 + $0x3] }
 0x116   :  { %s487_s8 = vpop.sfrf %486 }
 0x117   :  { %p625_p2 = scmp.ne.s32.totalorder %s487_s8, 0 }
 0x119   :  { %491 = shalt.err (%p625_p2)  }
 0x11a   :  { %493 = vsyncmov [#allocation3 + $0x4] }
 0x11d   :  { %s494_s3 = vpop.sfrf %493 }
 0x11e   :  { %p626_p3 = scmp.ne.s32.totalorder %s494_s3, 0 }
 0x120   :  { %498 = shalt.err (%p626_p3)  }
 0x121   :  { %500 = vsyncmov [#allocation3 + $0x5] }
 0x124   :  { %s501_s9 = vpop.sfrf %500 }
 0x125   :  { %p627_p4 = scmp.ne.s32.totalorder %s501_s9, 0 }
 0x127   :  { %505 = shalt.err (%p627_p4)  }
 0x128   :  { %507 = vsyncmov [#allocation3 + $0x6] }
 0x12b   :  { %s508_s10 = vpop.sfrf %507 }
 0x12c   :  { %p628_p5 = scmp.ne.s32.totalorder %s508_s10, 0 }
 0x12e   :  { %512 = shalt.err (%p628_p5)  }
 0x12f   :  { %514 = vsyncmov [#allocation3 + $0x7] }
 0x132   :  { %s515_s11 = vpop.sfrf %514 }
 0x133   :  { %p629_p6 = scmp.ne.s32.totalorder %s515_s11, 0 }
 0x135   :  { %519 = shalt.err (%p629_p6)  }

</bundles_post_ra>
